<compile_context>
chip_gen: v7x
topology: tpu7x:2x2x1
jax: 0.10.0
libtpu: 0.0.40
codegen_flags: <defaults>
</compile_context>

<pallas_src>
import math
import functools

import jax
import jax.numpy as jnp
from jax.experimental import pallas as pl
from jax.experimental.pallas import tpu as pltpu


def _layer_norm(v, gamma, beta, eps=1e-5):
    # v: (S, D) f32; gamma/beta: (1, D). Matches torch.nn.LayerNorm (biased variance).
    mean = jnp.mean(v, axis=-1, keepdims=True)
    centered = v - mean
    var = jnp.mean(centered * centered, axis=-1, keepdims=True)
    return centered * jax.lax.rsqrt(var + eps) * gamma + beta


def transformer_block_kernel(
    x_ref,                      # (1, S, D)   f32  (one batch per grid step)
    wqkv_ref, bqkv_ref,         # (3H, D, d_k) bf16, (3H, 1, d_k) f32   head-major fused QKV
    wo_ref, bo_ref,             # (H, d_k, D)  bf16, (1, D) f32         head-major out proj
    ln1_g_ref, ln1_b_ref,       # (1, D) f32
    w1_ref, b1_ref,             # (D, d_ff) bf16, (1, d_ff) f32
    w2_ref, b2_ref,             # (d_ff, D) bf16, (1, D)   f32
    ln2_g_ref, ln2_b_ref,       # (1, D) f32
    o_ref,                      # (1, S, D)
    *, n_heads: int,
):
    f32, bf16 = jnp.float32, jnp.bfloat16
    _, S, D = x_ref.shape
    H = n_heads
    d_k = D // H
    scale = 1.0 / math.sqrt(d_k)

    x = x_ref[0].astype(f32)            # (S, D) residual path stays f32
    x_bf = x.astype(bf16)               # MXU operand

    # --- Fused head-major QKV projection: one batched MXU dot_general over 3H heads ------
    xb = jnp.broadcast_to(x_bf, (3 * H, S, D))
    qkv = jnp.einsum("hsd,hdk->hsk", xb, wqkv_ref[...],
                     preferred_element_type=f32) + bqkv_ref[...]     # (3H, S, d_k) f32
    q = qkv[0 * H:1 * H].astype(bf16)                                # (H, S, d_k)
    k = qkv[1 * H:2 * H].astype(bf16)
    v = qkv[2 * H:3 * H].astype(bf16)

    # --- Multi-head self-attention, batched over heads (no Python unroll, no transposes) -
    scores = jnp.einsum("hqd,hkd->hqk", q, k,
                        preferred_element_type=f32) * scale          # (H, S, S) f32
    # TODO(synk): optional attention mask (mask==0 -> -1e9) not wired in; module default is
    #             mask=None.
    scores = scores - jnp.max(scores, axis=-1, keepdims=True)
    e = jnp.exp(scores)
    attn = e * pl.reciprocal(jnp.sum(e, axis=-1, keepdims=True), approx=True)
    ctx = jnp.einsum("hqk,hkd->hqd", attn.astype(bf16), v,
                     preferred_element_type=f32)                      # (H, S, d_k) f32

    # --- Output projection accumulated head-major: sum_h ctx_h @ wo_h (lane-dense) -------
    attn_out = jnp.sum(
        jnp.einsum("hqd,hdm->hqm", ctx.astype(bf16), wo_ref[...],
                   preferred_element_type=f32),
        axis=0) + bo_ref[...]                                         # (S, D) f32
    y1 = _layer_norm(x + attn_out, ln1_g_ref[...], ln1_b_ref[...])    # post-LN 1

    # --- Feed-forward (bf16 operands, f32 accumulation) -----------------------------------
    h1 = jnp.dot(y1.astype(bf16), w1_ref[...], preferred_element_type=f32) + b1_ref[...]
    h1 = jnp.maximum(h1, 0.0)
    ff = jnp.dot(h1.astype(bf16), w2_ref[...], preferred_element_type=f32) + b2_ref[...]
    out = _layer_norm(y1 + ff, ln2_g_ref[...], ln2_b_ref[...])        # post-LN 2

    o_ref[0] = out.astype(o_ref.dtype)


def prepare_params(params, n_heads):
    """One-time parameter prep: head-major fused layouts + bf16 weight casts.

    Hoisted out of the per-call forward path so the kernel invocation pays no
    concat / cast / reshape passes over the weights.
    """
    bf16 = jnp.bfloat16
    D = params["wq"].shape[0]
    H = n_heads
    d_k = D // H

    def head_major_w(w):   # (D, D) -> (H, D, d_k):  [h, d, k] = w[d, h*d_k + k]
        return w.reshape(D, H, d_k).transpose(1, 0, 2)

    def head_major_b(b):   # (1, D) -> (H, 1, d_k)
        return b.reshape(1, H, d_k).transpose(1, 0, 2)

    wqkv = jnp.concatenate(
        [head_major_w(params["wq"]), head_major_w(params["wk"]),
         head_major_w(params["wv"])], axis=0).astype(bf16)            # (3H, D, d_k)
    bqkv = jnp.concatenate(
        [head_major_b(params["bq"]), head_major_b(params["bk"]),
         head_major_b(params["bv"])], axis=0)                         # (3H, 1, d_k) f32
    wo = params["wo"].reshape(H, d_k, D).astype(bf16)                 # (H, d_k, D)

    return dict(
        wqkv=wqkv, bqkv=bqkv, wo=wo, bo=params["bo"],
        ln1_g=params["ln1_g"], ln1_b=params["ln1_b"],
        w1=params["w1"].astype(bf16), b1=params["b1"],
        w2=params["w2"].astype(bf16), b2=params["b2"],
        ln2_g=params["ln2_g"], ln2_b=params["ln2_b"],
    )


def transformer_block(x, prep, n_heads):
    B, S, D = x.shape
    three_h, _, d_k = prep["wqkv"].shape
    d_ff = prep["w1"].shape[1]
    assert three_h == 3 * n_heads and n_heads * d_k == D

    kernel = functools.partial(transformer_block_kernel, n_heads=n_heads)

    # Constant index_map => weight block is identical across grid steps: DMA'd once,
    # stays VMEM-resident for the whole call.
    def const(shape):
        return pl.BlockSpec(shape, lambda b: (0,) * len(shape))

    return pl.pallas_call(
        kernel,
        grid=(B,),
        in_specs=[
            pl.BlockSpec((1, S, D), lambda b: (b, 0, 0)),       # x: one batch per step
            const((three_h, D, d_k)),                           # wqkv (head-major)
            const((three_h, 1, d_k)),                           # bqkv
            const((n_heads, d_k, D)),                           # wo (head-major)
            const((1, D)),                                      # bo
            const((1, D)), const((1, D)),                       # ln1 gamma / beta
            const((D, d_ff)), const((1, d_ff)),                 # w1 / b1
            const((d_ff, D)), const((1, D)),                    # w2 / b2
            const((1, D)), const((1, D)),                       # ln2 gamma / beta
        ],
        out_specs=pl.BlockSpec((1, S, D), lambda b: (b, 0, 0)),
        out_shape=jax.ShapeDtypeStruct((B, S, D), x.dtype),
        compiler_params=pltpu.CompilerParams(
            dimension_semantics=("parallel",),
            vmem_limit_bytes=48 * 1024 * 1024,
        ),
    )(
        x,
        prep["wqkv"], prep["bqkv"],
        prep["wo"], prep["bo"],
        prep["ln1_g"], prep["ln1_b"],
        prep["w1"], prep["b1"], prep["w2"], prep["b2"],
        prep["ln2_g"], prep["ln2_b"],
    )


def _reference(x, p, n_heads):
    # Pure-JAX reference mirroring the kernel's precision policy
    # (bf16 matmul operands, f32 accumulation, f32 softmax/LN stats; dropout = identity).
    B, S, D = x.shape
    d_k = D // n_heads
    f32, bf16 = jnp.float32, jnp.bfloat16

    def mm(a, w):
        return jnp.dot(a.astype(bf16), w.astype(bf16), preferred_element_type=f32)

    def ln(v, g, b, eps=1e-5):
        m = jnp.mean(v, -1, keepdims=True)
        var = jnp.mean((v - m) ** 2, -1, keepdims=True)
        return (v - m) * jax.lax.rsqrt(var + eps) * g + b

    q = mm(x, p["wq"]) + p["bq"]
    k = mm(x, p["wk"]) + p["bk"]
    v = mm(x, p["wv"]) + p["bv"]
    q = q.reshape(B, S, n_heads, d_k).transpose(0, 2, 1, 3)
    k = k.reshape(B, S, n_heads, d_k).transpose(0, 2, 1, 3)
    v = v.reshape(B, S, n_heads, d_k).transpose(0, 2, 1, 3)
    scores = jnp.einsum("bhqd,bhkd->bhqk", q.astype(bf16), k.astype(bf16),
                        preferred_element_type=f32) / math.sqrt(d_k)
    attn = jax.nn.softmax(scores, axis=-1)
    ctx = jnp.einsum("bhqk,bhkd->bhqd", attn.astype(bf16), v.astype(bf16),
                     preferred_element_type=f32)
    ctx = ctx.transpose(0, 2, 1, 3).reshape(B, S, D)
    attn_out = ln(x + mm(ctx, p["wo"]) + p["bo"], p["ln1_g"], p["ln1_b"])
    h = jax.nn.relu(mm(attn_out, p["w1"]) + p["b1"])
    ff = mm(h, p["w2"]) + p["b2"]
    return ln(attn_out + ff, p["ln2_g"], p["ln2_b"])


def make_params(key, d_model, d_ff):
    ks = jax.random.split(key, 12)

    def linear(kw, kb, fan_in, fan_out):
        bound = 1.0 / math.sqrt(fan_in)
        w = jax.random.uniform(kw, (fan_in, fan_out), jnp.float32, -bound, bound)
        b = jax.random.uniform(kb, (1, fan_out), jnp.float32, -bound, bound)
        return w, b

    wq, bq = linear(ks[0], ks[1], d_model, d_model)
    wk, bk = linear(ks[2], ks[3], d_model, d_model)
    wv, bv = linear(ks[4], ks[5], d_model, d_model)
    wo, bo = linear(ks[6], ks[7], d_model, d_model)
    w1, b1 = linear(ks[8], ks[9], d_model, d_ff)
    w2, b2 = linear(ks[10], ks[11], d_ff, d_model)
    return dict(
        wq=wq, bq=bq, wk=wk, bk=bk, wv=wv, bv=bv, wo=wo, bo=bo,
        ln1_g=jnp.ones((1, d_model), jnp.float32), ln1_b=jnp.zeros((1, d_model), jnp.float32),
        w1=w1, b1=b1, w2=w2, b2=b2,
        ln2_g=jnp.ones((1, d_model), jnp.float32), ln2_b=jnp.zeros((1, d_model), jnp.float32),
    )


if __name__ == "__main__":
    B, S, D, H, DFF = 2, 8, 32, 4, 64
    key = jax.random.PRNGKey(0)
    kx, kp = jax.random.split(key)
    x = jax.random.normal(kx, (B, S, D), jnp.float32)
    params = make_params(kp, D, DFF)

    prep = prepare_params(params, H)        # one-time weight prep (hoisted out of forward)
    out = transformer_block(x, prep, n_heads=H)
    out = jax.block_until_ready(out)

    ref = _reference(x, params, H)
    assert out.shape == (B, S, D)
    err = jnp.max(jnp.abs(out - ref))
    assert float(err) < 2e-2, f"mismatch vs reference (max abs err = {float(err)})"
    print("KERNEL_OK")
</pallas_src>

<mosaic_0001>
module attributes {stable_mosaic.version = 11 : i64} {
  func.func @transformer_block_kernel(%arg0: i32, %arg1: memref<1x8x32xf32, #tpu.memory_space<vmem>>, %arg2: memref<12x32x8xbf16, #tpu.memory_space<vmem>>, %arg3: memref<12x1x8xf32, #tpu.memory_space<vmem>>, %arg4: memref<4x8x32xbf16, #tpu.memory_space<vmem>>, %arg5: memref<1x32xf32, #tpu.memory_space<vmem>>, %arg6: memref<1x32xf32, #tpu.memory_space<vmem>>, %arg7: memref<1x32xf32, #tpu.memory_space<vmem>>, %arg8: memref<32x64xbf16, #tpu.memory_space<vmem>>, %arg9: memref<1x64xf32, #tpu.memory_space<vmem>>, %arg10: memref<64x32xbf16, #tpu.memory_space<vmem>>, %arg11: memref<1x32xf32, #tpu.memory_space<vmem>>, %arg12: memref<1x32xf32, #tpu.memory_space<vmem>>, %arg13: memref<1x32xf32, #tpu.memory_space<vmem>>, %arg14: memref<1x8x32xf32, #tpu.memory_space<vmem>>) attributes {dimension_semantics = [#tpu.dimension_semantics<parallel>], iteration_bounds = array<i64: 2>, scalar_prefetch = 0 : i64, scratch_operands = 0 : i64, tpu.core_type = #tpu.core_type<tc>, window_params = [{transform_indices = @transform_0, window_bounds = array<i64: 1, 8, 32>}, {pipeline_mode = #tpu.pipeline_mode<synchronous>, transform_indices = @transform_1, window_bounds = array<i64: 12, 32, 8>}, {pipeline_mode = #tpu.pipeline_mode<synchronous>, transform_indices = @transform_2, window_bounds = array<i64: 12, 1, 8>}, {pipeline_mode = #tpu.pipeline_mode<synchronous>, transform_indices = @transform_3, window_bounds = array<i64: 4, 8, 32>}, {pipeline_mode = #tpu.pipeline_mode<synchronous>, transform_indices = @transform_4, window_bounds = array<i64: 1, 32>}, {pipeline_mode = #tpu.pipeline_mode<synchronous>, transform_indices = @transform_5, window_bounds = array<i64: 1, 32>}, {pipeline_mode = #tpu.pipeline_mode<synchronous>, transform_indices = @transform_6, window_bounds = array<i64: 1, 32>}, {pipeline_mode = #tpu.pipeline_mode<synchronous>, transform_indices = @transform_7, window_bounds = array<i64: 32, 64>}, {pipeline_mode = #tpu.pipeline_mode<synchronous>, transform_indices = @transform_8, window_bounds = array<i64: 1, 64>}, {pipeline_mode = #tpu.pipeline_mode<synchronous>, transform_indices = @transform_9, window_bounds = array<i64: 64, 32>}, {pipeline_mode = #tpu.pipeline_mode<synchronous>, transform_indices = @transform_10, window_bounds = array<i64: 1, 32>}, {pipeline_mode = #tpu.pipeline_mode<synchronous>, transform_indices = @transform_11, window_bounds = array<i64: 1, 32>}, {pipeline_mode = #tpu.pipeline_mode<synchronous>, transform_indices = @transform_12, window_bounds = array<i64: 1, 32>}, {transform_indices = @transform_13, window_bounds = array<i64: 1, 8, 32>}]} {
    %c0 = arith.constant 0 : index
    %c0_0 = arith.constant 0 : index
    %c0_1 = arith.constant 0 : index
    %0 = vector.load %arg1[%c0, %c0_0, %c0_1] : memref<1x8x32xf32, #tpu.memory_space<vmem>>, vector<1x8x32xf32>
    %1 = vector.shape_cast %0 : vector<1x8x32xf32> to vector<8x32xf32>
    %2 = arith.truncf %1 : vector<8x32xf32> to vector<8x32xbf16>
    %3 = vector.shape_cast %2 : vector<8x32xbf16> to vector<1x8x32xbf16>
    %4 = vector.broadcast %3 : vector<1x8x32xbf16> to vector<12x8x32xbf16>
    %c0_2 = arith.constant 0 : index
    %c0_3 = arith.constant 0 : index
    %c0_4 = arith.constant 0 : index
    %5 = vector.load %arg2[%c0_2, %c0_3, %c0_4] : memref<12x32x8xbf16, #tpu.memory_space<vmem>>, vector<12x32x8xbf16>
    "tpu.trace_start"() <{level = 10 : i32, message = "hsd,hdk->hsk"}> : () -> ()
    %cst = arith.constant dense<0.000000e+00> : vector<12x8x8xf32>
    %6 = tpu.matmul %4, %5, %cst {dimension_numbers = #tpu.dot_dimension_numbers<[2], [1], [1], [2], [0, 0, 0, 1, 1, 2], [0], [0]>} : vector<12x8x32xbf16>, vector<12x32x8xbf16>, vector<12x8x8xf32> -> vector<12x8x8xf32>
    "tpu.trace_stop"() : () -> ()
    %c0_5 = arith.constant 0 : index
    %c0_6 = arith.constant 0 : index
    %c0_7 = arith.constant 0 : index
    %7 = vector.load %arg3[%c0_5, %c0_6, %c0_7] : memref<12x1x8xf32, #tpu.memory_space<vmem>>, vector<12x1x8xf32>
    %8 = vector.broadcast %7 : vector<12x1x8xf32> to vector<12x8x8xf32>
    %9 = arith.addf %6, %8 : vector<12x8x8xf32>
    %10 = vector.extract_strided_slice %9 {offsets = [0, 0, 0], sizes = [4, 8, 8], strides = [1, 1, 1]} : vector<12x8x8xf32> to vector<4x8x8xf32>
    %11 = arith.truncf %10 : vector<4x8x8xf32> to vector<4x8x8xbf16>
    %12 = vector.extract_strided_slice %9 {offsets = [4, 0, 0], sizes = [4, 8, 8], strides = [1, 1, 1]} : vector<12x8x8xf32> to vector<4x8x8xf32>
    %13 = arith.truncf %12 : vector<4x8x8xf32> to vector<4x8x8xbf16>
    %14 = vector.extract_strided_slice %9 {offsets = [8, 0, 0], sizes = [4, 8, 8], strides = [1, 1, 1]} : vector<12x8x8xf32> to vector<4x8x8xf32>
    %15 = arith.truncf %14 : vector<4x8x8xf32> to vector<4x8x8xbf16>
    "tpu.trace_start"() <{level = 10 : i32, message = "hqd,hkd->hqk"}> : () -> ()
    %cst_8 = arith.constant dense<0.000000e+00> : vector<4x8x8xf32>
    %16 = tpu.matmul %11, %13, %cst_8 {dimension_numbers = #tpu.dot_dimension_numbers<[2], [2], [1], [1], [0, 0, 0, 1, 1, 1], [0], [0]>} : vector<4x8x8xbf16>, vector<4x8x8xbf16>, vector<4x8x8xf32> -> vector<4x8x8xf32>
    "tpu.trace_stop"() : () -> ()
    %cst_9 = arith.constant 0.353553385 : f32
    %17 = vector.broadcast %cst_9 : f32 to vector<4x8x8xf32>
    %18 = arith.mulf %16, %17 : vector<4x8x8xf32>
    %cst_10 = arith.constant dense<0xFF800000> : vector<4x8xf32>
    %19 = vector.multi_reduction <maximumf>, %18, %cst_10 [2] : vector<4x8x8xf32> to vector<4x8xf32>
    %20 = vector.shape_cast %19 : vector<4x8xf32> to vector<4x8x1xf32>
    %21 = vector.broadcast %20 : vector<4x8x1xf32> to vector<4x8x8xf32>
    %22 = arith.subf %18, %21 : vector<4x8x8xf32>
    %23 = math.exp %22 : vector<4x8x8xf32>
    %cst_11 = arith.constant dense<0.000000e+00> : vector<4x8xf32>
    %24 = vector.multi_reduction <add>, %23, %cst_11 [2] : vector<4x8x8xf32> to vector<4x8xf32>
    %25 = vector.shape_cast %24 : vector<4x8xf32> to vector<4x8x1xf32>
    %26 = tpu.reciprocal %25 {approx = true} : vector<4x8x1xf32> -> vector<4x8x1xf32>
    %27 = vector.broadcast %26 : vector<4x8x1xf32> to vector<4x8x8xf32>
    %28 = arith.mulf %23, %27 : vector<4x8x8xf32>
    %29 = arith.truncf %28 : vector<4x8x8xf32> to vector<4x8x8xbf16>
    "tpu.trace_start"() <{level = 10 : i32, message = "hqk,hkd->hqd"}> : () -> ()
    %cst_12 = arith.constant dense<0.000000e+00> : vector<4x8x8xf32>
    %30 = tpu.matmul %29, %15, %cst_12 {dimension_numbers = #tpu.dot_dimension_numbers<[2], [1], [1], [2], [0, 0, 0, 1, 1, 2], [0], [0]>} : vector<4x8x8xbf16>, vector<4x8x8xbf16>, vector<4x8x8xf32> -> vector<4x8x8xf32>
    "tpu.trace_stop"() : () -> ()
    %31 = arith.truncf %30 : vector<4x8x8xf32> to vector<4x8x8xbf16>
    %c0_13 = arith.constant 0 : index
    %c0_14 = arith.constant 0 : index
    %c0_15 = arith.constant 0 : index
    %32 = vector.load %arg4[%c0_13, %c0_14, %c0_15] : memref<4x8x32xbf16, #tpu.memory_space<vmem>>, vector<4x8x32xbf16>
    "tpu.trace_start"() <{level = 10 : i32, message = "hqd,hdm->hqm"}> : () -> ()
    %cst_16 = arith.constant dense<0.000000e+00> : vector<4x8x32xf32>
    %33 = tpu.matmul %31, %32, %cst_16 {dimension_numbers = #tpu.dot_dimension_numbers<[2], [1], [1], [2], [0, 0, 0, 1, 1, 2], [0], [0]>} : vector<4x8x8xbf16>, vector<4x8x32xbf16>, vector<4x8x32xf32> -> vector<4x8x32xf32>
    "tpu.trace_stop"() : () -> ()
    %cst_17 = arith.constant dense<0.000000e+00> : vector<8x32xf32>
    %34 = vector.multi_reduction <add>, %33, %cst_17 [0] : vector<4x8x32xf32> to vector<8x32xf32>
    %c0_18 = arith.constant 0 : index
    %c0_19 = arith.constant 0 : index
    %35 = vector.load %arg5[%c0_18, %c0_19] : memref<1x32xf32, #tpu.memory_space<vmem>>, vector<1x32xf32>
    %36 = vector.broadcast %35 : vector<1x32xf32> to vector<8x32xf32>
    %37 = arith.addf %34, %36 : vector<8x32xf32>
    %38 = arith.addf %1, %37 : vector<8x32xf32>
    %c0_20 = arith.constant 0 : index
    %c0_21 = arith.constant 0 : index
    %39 = vector.load %arg6[%c0_20, %c0_21] : memref<1x32xf32, #tpu.memory_space<vmem>>, vector<1x32xf32>
    %c0_22 = arith.constant 0 : index
    %c0_23 = arith.constant 0 : index
    %40 = vector.load %arg7[%c0_22, %c0_23] : memref<1x32xf32, #tpu.memory_space<vmem>>, vector<1x32xf32>
    %cst_24 = arith.constant dense<0.000000e+00> : vector<8xf32>
    %41 = vector.multi_reduction <add>, %38, %cst_24 [1] : vector<8x32xf32> to vector<8xf32>
    %42 = vector.shape_cast %41 : vector<8xf32> to vector<8x1xf32>
    %cst_25 = arith.constant 3.200000e+01 : f32
    %43 = vector.broadcast %cst_25 : f32 to vector<8x1xf32>
    %44 = arith.divf %42, %43 : vector<8x1xf32>
    %45 = vector.broadcast %44 : vector<8x1xf32> to vector<8x32xf32>
    %46 = arith.subf %38, %45 : vector<8x32xf32>
    %47 = arith.mulf %46, %46 : vector<8x32xf32>
    %cst_26 = arith.constant dense<0.000000e+00> : vector<8xf32>
    %48 = vector.multi_reduction <add>, %47, %cst_26 [1] : vector<8x32xf32> to vector<8xf32>
    %49 = vector.shape_cast %48 : vector<8xf32> to vector<8x1xf32>
    %cst_27 = arith.constant 3.200000e+01 : f32
    %50 = vector.broadcast %cst_27 : f32 to vector<8x1xf32>
    %51 = arith.divf %49, %50 : vector<8x1xf32>
    %cst_28 = arith.constant 9.99999974E-6 : f32
    %52 = vector.broadcast %cst_28 : f32 to vector<8x1xf32>
    %53 = arith.addf %51, %52 : vector<8x1xf32>
    %54 = math.rsqrt %53 : vector<8x1xf32>
    %55 = vector.broadcast %54 : vector<8x1xf32> to vector<8x32xf32>
    %56 = arith.mulf %46, %55 : vector<8x32xf32>
    %57 = vector.broadcast %39 : vector<1x32xf32> to vector<8x32xf32>
    %58 = arith.mulf %56, %57 : vector<8x32xf32>
    %59 = vector.broadcast %40 : vector<1x32xf32> to vector<8x32xf32>
    %60 = arith.addf %58, %59 : vector<8x32xf32>
    %61 = arith.truncf %60 : vector<8x32xf32> to vector<8x32xbf16>
    %c0_29 = arith.constant 0 : index
    %c0_30 = arith.constant 0 : index
    %62 = vector.load %arg8[%c0_29, %c0_30] : memref<32x64xbf16, #tpu.memory_space<vmem>>, vector<32x64xbf16>
    %cst_31 = arith.constant dense<0.000000e+00> : vector<8x64xf32>
    %63 = tpu.matmul %61, %62, %cst_31 {dimension_numbers = #tpu.dot_dimension_numbers<[1], [0], [0], [1], [0, 0, 1, 1], [], []>} : vector<8x32xbf16>, vector<32x64xbf16>, vector<8x64xf32> -> vector<8x64xf32>
    %c0_32 = arith.constant 0 : index
    %c0_33 = arith.constant 0 : index
    %64 = vector.load %arg9[%c0_32, %c0_33] : memref<1x64xf32, #tpu.memory_space<vmem>>, vector<1x64xf32>
    %65 = vector.broadcast %64 : vector<1x64xf32> to vector<8x64xf32>
    %66 = arith.addf %63, %65 : vector<8x64xf32>
    %cst_34 = arith.constant 0.000000e+00 : f32
    %67 = vector.broadcast %cst_34 : f32 to vector<8x64xf32>
    %68 = arith.maximumf %66, %67 : vector<8x64xf32>
    %69 = arith.truncf %68 : vector<8x64xf32> to vector<8x64xbf16>
    %c0_35 = arith.constant 0 : index
    %c0_36 = arith.constant 0 : index
    %70 = vector.load %arg10[%c0_35, %c0_36] : memref<64x32xbf16, #tpu.memory_space<vmem>>, vector<64x32xbf16>
    %cst_37 = arith.constant dense<0.000000e+00> : vector<8x32xf32>
    %71 = tpu.matmul %69, %70, %cst_37 {dimension_numbers = #tpu.dot_dimension_numbers<[1], [0], [0], [1], [0, 0, 1, 1], [], []>} : vector<8x64xbf16>, vector<64x32xbf16>, vector<8x32xf32> -> vector<8x32xf32>
    %c0_38 = arith.constant 0 : index
    %c0_39 = arith.constant 0 : index
    %72 = vector.load %arg11[%c0_38, %c0_39] : memref<1x32xf32, #tpu.memory_space<vmem>>, vector<1x32xf32>
    %73 = vector.broadcast %72 : vector<1x32xf32> to vector<8x32xf32>
    %74 = arith.addf %71, %73 : vector<8x32xf32>
    %75 = arith.addf %60, %74 : vector<8x32xf32>
    %c0_40 = arith.constant 0 : index
    %c0_41 = arith.constant 0 : index
    %76 = vector.load %arg12[%c0_40, %c0_41] : memref<1x32xf32, #tpu.memory_space<vmem>>, vector<1x32xf32>
    %c0_42 = arith.constant 0 : index
    %c0_43 = arith.constant 0 : index
    %77 = vector.load %arg13[%c0_42, %c0_43] : memref<1x32xf32, #tpu.memory_space<vmem>>, vector<1x32xf32>
    %cst_44 = arith.constant dense<0.000000e+00> : vector<8xf32>
    %78 = vector.multi_reduction <add>, %75, %cst_44 [1] : vector<8x32xf32> to vector<8xf32>
    %79 = vector.shape_cast %78 : vector<8xf32> to vector<8x1xf32>
    %cst_45 = arith.constant 3.200000e+01 : f32
    %80 = vector.broadcast %cst_45 : f32 to vector<8x1xf32>
    %81 = arith.divf %79, %80 : vector<8x1xf32>
    %82 = vector.broadcast %81 : vector<8x1xf32> to vector<8x32xf32>
    %83 = arith.subf %75, %82 : vector<8x32xf32>
    %84 = arith.mulf %83, %83 : vector<8x32xf32>
    %cst_46 = arith.constant dense<0.000000e+00> : vector<8xf32>
    %85 = vector.multi_reduction <add>, %84, %cst_46 [1] : vector<8x32xf32> to vector<8xf32>
    %86 = vector.shape_cast %85 : vector<8xf32> to vector<8x1xf32>
    %cst_47 = arith.constant 3.200000e+01 : f32
    %87 = vector.broadcast %cst_47 : f32 to vector<8x1xf32>
    %88 = arith.divf %86, %87 : vector<8x1xf32>
    %cst_48 = arith.constant 9.99999974E-6 : f32
    %89 = vector.broadcast %cst_48 : f32 to vector<8x1xf32>
    %90 = arith.addf %88, %89 : vector<8x1xf32>
    %91 = math.rsqrt %90 : vector<8x1xf32>
    %92 = vector.broadcast %91 : vector<8x1xf32> to vector<8x32xf32>
    %93 = arith.mulf %83, %92 : vector<8x32xf32>
    %94 = vector.broadcast %76 : vector<1x32xf32> to vector<8x32xf32>
    %95 = arith.mulf %93, %94 : vector<8x32xf32>
    %96 = vector.broadcast %77 : vector<1x32xf32> to vector<8x32xf32>
    %97 = arith.addf %95, %96 : vector<8x32xf32>
    %c0_49 = arith.constant 0 : index
    %c0_50 = arith.constant 0 : index
    %c0_51 = arith.constant 0 : index
    %98 = vector.load %arg14[%c0_49, %c0_50, %c0_51] : memref<1x8x32xf32, #tpu.memory_space<vmem>>, vector<1x8x32xf32>
    %99 = vector.shape_cast %98 : vector<1x8x32xf32> to vector<8x32xf32>
    %100 = vector.shape_cast %97 : vector<8x32xf32> to vector<1x8x32xf32>
    tpu.vector_store %arg14[%c0_49, %c0_50, %c0_51], %100 {strides = array<i32>} : memref<1x8x32xf32, #tpu.memory_space<vmem>>, vector<1x8x32xf32>,
    return
  }
  func.func @transform_0(%arg0: i32) -> (i32, i32, i32) {
    %c0_i32 = arith.constant 0 : i32
    %c0_i32_0 = arith.constant 0 : i32
    %c0_i32_1 = arith.constant 0 : i32
    return %arg0, %c0_i32, %c0_i32_0 : i32, i32, i32
  }
  func.func @transform_1(%arg0: i32) -> (i32, i32, i32) {
    %c0_i32 = arith.constant 0 : i32
    %c0_i32_0 = arith.constant 0 : i32
    %c0_i32_1 = arith.constant 0 : i32
    %c0_i32_2 = arith.constant 0 : i32
    return %c0_i32, %c0_i32_0, %c0_i32_1 : i32, i32, i32
  }
  func.func @transform_2(%arg0: i32) -> (i32, i32, i32) {
    %c0_i32 = arith.constant 0 : i32
    %c0_i32_0 = arith.constant 0 : i32
    %c0_i32_1 = arith.constant 0 : i32
    %c0_i32_2 = arith.constant 0 : i32
    return %c0_i32, %c0_i32_0, %c0_i32_1 : i32, i32, i32
  }
  func.func @transform_3(%arg0: i32) -> (i32, i32, i32) {
    %c0_i32 = arith.constant 0 : i32
    %c0_i32_0 = arith.constant 0 : i32
    %c0_i32_1 = arith.constant 0 : i32
    %c0_i32_2 = arith.constant 0 : i32
    return %c0_i32, %c0_i32_0, %c0_i32_1 : i32, i32, i32
  }
  func.func @transform_4(%arg0: i32) -> (i32, i32) {
    %c0_i32 = arith.constant 0 : i32
    %c0_i32_0 = arith.constant 0 : i32
    %c0_i32_1 = arith.constant 0 : i32
    return %c0_i32, %c0_i32_0 : i32, i32
  }
  func.func @transform_5(%arg0: i32) -> (i32, i32) {
    %c0_i32 = arith.constant 0 : i32
    %c0_i32_0 = arith.constant 0 : i32
    %c0_i32_1 = arith.constant 0 : i32
    return %c0_i32, %c0_i32_0 : i32, i32
  }
  func.func @transform_6(%arg0: i32) -> (i32, i32) {
    %c0_i32 = arith.constant 0 : i32
    %c0_i32_0 = arith.constant 0 : i32
    %c0_i32_1 = arith.constant 0 : i32
    return %c0_i32, %c0_i32_0 : i32, i32
  }
  func.func @transform_7(%arg0: i32) -> (i32, i32) {
    %c0_i32 = arith.constant 0 : i32
    %c0_i32_0 = arith.constant 0 : i32
    %c0_i32_1 = arith.constant 0 : i32
    return %c0_i32, %c0_i32_0 : i32, i32
  }
  func.func @transform_8(%arg0: i32) -> (i32, i32) {
    %c0_i32 = arith.constant 0 : i32
    %c0_i32_0 = arith.constant 0 : i32
    %c0_i32_1 = arith.constant 0 : i32
    return %c0_i32, %c0_i32_0 : i32, i32
  }
  func.func @transform_9(%arg0: i32) -> (i32, i32) {
    %c0_i32 = arith.constant 0 : i32
    %c0_i32_0 = arith.constant 0 : i32
    %c0_i32_1 = arith.constant 0 : i32
    return %c0_i32, %c0_i32_0 : i32, i32
  }
  func.func @transform_10(%arg0: i32) -> (i32, i32) {
    %c0_i32 = arith.constant 0 : i32
    %c0_i32_0 = arith.constant 0 : i32
    %c0_i32_1 = arith.constant 0 : i32
    return %c0_i32, %c0_i32_0 : i32, i32
  }
  func.func @transform_11(%arg0: i32) -> (i32, i32) {
    %c0_i32 = arith.constant 0 : i32
    %c0_i32_0 = arith.constant 0 : i32
    %c0_i32_1 = arith.constant 0 : i32
    return %c0_i32, %c0_i32_0 : i32, i32
  }
  func.func @transform_12(%arg0: i32) -> (i32, i32) {
    %c0_i32 = arith.constant 0 : i32
    %c0_i32_0 = arith.constant 0 : i32
    %c0_i32_1 = arith.constant 0 : i32
    return %c0_i32, %c0_i32_0 : i32, i32
  }
  func.func @transform_13(%arg0: i32) -> (i32, i32, i32) {
    %c0_i32 = arith.constant 0 : i32
    %c0_i32_0 = arith.constant 0 : i32
    %c0_i32_1 = arith.constant 0 : i32
    return %arg0, %c0_i32, %c0_i32_0 : i32, i32, i32
  }
}

</mosaic_0001>

<bundles_post_ra>
// kernel: tpu_custom_call.1
= control target key start
LH: loop header
LB: loop body
LE: loop exit
PB: predicated region body
PF: predicated region fallthrough
CT: control target
= control target key end

     0   :  { %s3128_s0 = inlined_call_operand.vmem [shape: f32[2,8,32], index: 0, kind: input, shape index: {}]   ;;  %s3129_s1 = inlined_call_operand.vmem [shape: bf16[12,32,8], index: 1, kind: input, shape index: {}]   ;;  %s3130_s2 = inlined_call_operand.vmem [shape: f32[12,1,8], index: 2, kind: input, shape index: {}]   ;;  %s3131_s3 = inlined_call_operand.vmem [shape: bf16[4,8,32], index: 3, kind: input, shape index: {}]   ;;  %s3132_s4 = inlined_call_operand.vmem [shape: f32[1,32], index: 4, kind: input, shape index: {}]   ;;  %s3133_s5 = inlined_call_operand.vmem [shape: f32[1,32], index: 5, kind: input, shape index: {}]   ;;  %s3134_s6 = inlined_call_operand.vmem [shape: f32[1,32], index: 6, kind: input, shape index: {}]   ;;  %s3135_s7 = inlined_call_operand.vmem [shape: bf16[32,64], index: 7, kind: input, shape index: {}]   ;;  %s3136_s8 = inlined_call_operand.vmem [shape: f32[1,64], index: 8, kind: input, shape index: {}]   ;;  %s3137_s9 = inlined_call_operand.vmem [shape: bf16[64,32], index: 9, kind: input, shape index: {}]   ;;  %s3138_s10 = inlined_call_operand.vmem [shape: f32[1,32], index: 10, kind: input, shape index: {}]   ;;  %s3139_s11 = inlined_call_operand.vmem [shape: f32[1,32], index: 11, kind: input, shape index: {}]   ;;  %s3140_s12 = inlined_call_operand.vmem [shape: f32[1,32], index: 12, kind: input, shape index: {}]   ;;  %s3141_s13 = inlined_call_operand.hbm [shape: f32[2,8,32], index: 13, kind: output, shape index: {}]  }
   0x1   :  { %3142 = sst [smem:[#allocation6_spill]] %s3128_s0 }
   0x2   :  { %3143 = sst [smem:[#allocation7_spill]] %s3129_s1 }
   0x3   :  { %3144 = sst [smem:[#allocation8_spill]] %s3130_s2 }
   0x4   :  { %18 = vsyncpa [#allocation3], 0 }
   0x5   :  { %20 = vsyncpa [#allocation3 + $0x1], 0  ;;  %s2696_s25 = smov 0   ;;  %s2698_s26 = smov 0  }
   0x6   :  { %s2700_s27 = smov 0   ;;  %s2702_s28 = smov 0  }
   0x7 LB: > { %s2717_s29 = sadd.s32 4294967295, %s2621_s28   ;;  %s2127_s30 = sadd.s32 4294967294, %s2621_s28   ;;  %s2621_s28 = sphi %s2702_s28, %s3155_s28   ;;  %s2617_s27 = sphi %s2700_s27, %s3154_s27   ;;  %s2613_s26 = sphi %s2698_s26, %s3153_s26   ;;  %s2609_s25 = sphi %s2696_s25, %s3152_s25  }
   0x8   : > { %s2721_s14 = sadd.s32 1, %s2621_s28   ;;  %s311_s15 = sadd.s32 1, %s2617_s27 }
   0x9   : > { %s308_s16 = ssub.s32 %s2621_s28, %s2721_s14  ;;  %p321_p0 = scmp.ne.s32.totalorder %s2617_s27, %s2613_s26 }
   0xa   : > { %p309_p1 = scmp.eq.s32.totalorder %s308_s16, 0  ;;  %p322_p2 = scmp.eq.s32.totalorder %s2717_s29, 1 }
   0xb   : > { %p327_p3 = scmp.ne.s32.totalorder %s2613_s26, %s2609_s25  ;;  %p328_p4 = scmp.eq.s32.totalorder %s2127_s30, 1 }
   0xc   : > { %s2732_s17 = scalar_select %p309_p1, %s2617_s27, %s311_s15  }
   0xd   : > { %p2734_p5 = por %p322_p2, %p321_p0  ;;  %p2738_p6 = por %p328_p4, %p327_p3 }
   0xe   : > { %3145 = sst [smem:[#allocation5_spill]] %s2732_s17  ;;  %p2130_p7 = scmp.ge.s32.totalorder %s2621_s28, 1 }
   0xf   : > { %p389_p8 = scmp.lt.s32.totalorder %s2621_s28, 3 }
  0x11   : > { %p390_p9 = pnand %p2130_p7, %p389_p8 }
  0x12   : > { %s3148_s1 = sld [smem:[#allocation7_spill]] (!%p390_p9)  ;;  %v2623_v1 = vmov (!%p390_p9), 0.0   ;;  %vm2624_vm0 = vmmov (!%p390_p9), 0   ;;  %p432_p10 = scmp.lt.s32.totalorder (!%p390_p9), %s2717_s29, 1  ;;  %vm583_vm1 = vcmask (!%p390_p9), 261120   ;;  %vm1211_vm2 = vcmask (!%p390_p9), 64512  }
  0x13   : > { %393 = sbr.rel (%p390_p9) target bundleno = 2324 (0x914), region = 72  ;;  %2280 = vmatprep.subr.bf16.mxu0 (!%p390_p9), %v2623_v1  ;;  %2288 = vmatprep.subr.bf16.mxu1 (!%p390_p9), %v2623_v1  ;;  %s3149_s0 = sld [smem:[#allocation6_spill]] (!%p390_p9)  ;;  %vm1451_vm3 = vcmask (!%p390_p9), 1043456   ;;  %vm1979_vm4 = vcmask (!%p390_p9), 523264  }
  0x14   : > { %2284 = vmatprep.mubr.msk.bf16.mxu0 (!%p390_p9), %vm2624_vm0, %v2623_v1  ;;  %2292 = vmatprep.mubr.msk.bf16.mxu1 (!%p390_p9), %vm2624_vm0, %v2623_v1  ;;  %s3150_s2 = sld [smem:[#allocation8_spill]] (!%p390_p9)  ;;  %s2209_s30 = sshll.u32 (!%p390_p9), %s2717_s29, 7 }
  0x18   : > { %v2509_v0 = vld [vmem:[%s3148_s1] sm:$0xff] (!%p390_p9)   ;;  %v2510_v2 = vld [vmem:[%s3148_s1 + $0x10] sm:$0xff] (!%p390_p9)   ;;  %v2511_v3 = vld [vmem:[%s3148_s1 + $0x8] sm:$0xff] (!%p390_p9)  }
  0x19   : > { %2281 = vmatpush3.bf16.msra.mxu0 (!%p390_p9), %v2509_v0  ;;  %2289 = vmatpush3.bf16.msra.mxu1 (!%p390_p9), %v2510_v2  ;;  %v2512_v4 = vld [vmem:[%s3148_s1 + $0x18] sm:$0xff] (!%p390_p9)   ;;  %v2513_v5 = vld [vmem:[%s3148_s1 + $0x20] sm:$0xff] (!%p390_p9)   ;;  %v2514_v6 = vld [vmem:[%s3148_s1 + $0x30] sm:$0xff] (!%p390_p9)  }
  0x1a   : > { %2282 = vmatprep.subr.bf16.mxu0 %v2623_v1  ;;  %2290 = vmatprep.subr.bf16.mxu1 %v2623_v1  ;;  %s433_s20 = scalar_select %p432_p10, %s2717_s29, 1  ;;  %v2515_v9 = vld [vmem:[%s3148_s1 + $0x28] sm:$0xff]   ;;  %v2516_v10 = vld [vmem:[%s3148_s1 + $0x38] sm:$0xff]   ;;  %v2517_v11 = vld [vmem:[%s3148_s1 + $0x40] sm:$0xff]  }
  0x1b   : > { %v2518_v12 = vld [vmem:[%s3148_s1 + $0x50] sm:$0xff]   ;;  %v2519_v13 = vld [vmem:[%s3148_s1 + $0x48] sm:$0xff]   ;;  %v2520_v14 = vld [vmem:[%s3148_s1 + $0x58] sm:$0xff]   ;;  %s2625_s29 = smov [#allocation2]  }
  0x1c   : > { %s2132_s21 = sshll.u32 %s433_s20, 3  ;;  %v2521_v15 = vld [vmem:[%s3148_s1 + $0x60] sm:$0xff]   ;;  %v2522_v16 = vld [vmem:[%s3148_s1 + $0x70] sm:$0xff]   ;;  %v2523_v17 = vld [vmem:[%s3148_s1 + $0x68] sm:$0xff]   ;;  %s429_s20 = sand.u32 1, %s2613_s26  }
  0x1d   : > { %2283 = vmatpush3.bf16.msra.mxu0 %v2511_v3  ;;  %2291 = vmatpush3.bf16.msra.mxu1 %v2512_v4  ;;  %s435_s17 = scalar_lea.vmem %s3149_s0, %s2132_s21  ;;  %v2524_v18 = vld [vmem:[%s3148_s1 + $0x78] sm:$0xff]   ;;  %v2525_v19 = vld [vmem:[%s3148_s1 + $0x80] sm:$0xff]   ;;  %v2526_v20 = vld [vmem:[%s3148_s1 + $0x90] sm:$0xff]   ;;  %s2131_s21 = sshll.u32 %s429_s20, 3 }
  0x1e   : > { %2296 = vmatprep.subr.bf16.mxu0 %v2623_v1  ;;  %v2776_v7 = vld [vmem:[%s435_s17] sm:$0xff]  ;;  %2304 = vmatprep.subr.bf16.mxu1 %v2623_v1  ;;  %v2527_v21 = vld [vmem:[%s3148_s1 + $0x88] sm:$0xff]   ;;  %v2528_v22 = vld [vmem:[%s3148_s1 + $0x98] sm:$0xff]   ;;  %s431_s15 = scalar_lea.vmem [#allocation2], %s2131_s21  ;;  %s2055_s17 = scalar_lea.sflag [#allocation3], %s429_s20 }
  0x1f   : > { %v2781_v8 = vpack.c.bf16 %v2776_v7, %v2776_v7  ;;  %v2529_v23 = vld [vmem:[%s3148_s1 + $0xa0] sm:$0xff]   ;;  %v2530_v24 = vld [vmem:[%s3148_s1 + $0xb0] sm:$0xff]   ;;  %v2531_v25 = vld [vmem:[%s3148_s1 + $0xa8] sm:$0xff]   ;;  %s2068_s16 = sshll.u32 %s431_s15, 4  ;;  %s2563_s21 = sshll.u32 %s2625_s29, 4  ;;  %s3087_s16 = int_to_ptr.vmem [resolvable:$true] %s2068_s16  ;;  %s2564_s21 = int_to_ptr.vmem [resolvable:$false] %s2563_s21 }
  0x20   : > { %v2532_v26 = vld [vmem:[%s3148_s1 + $0xb8] sm:$0xff]   ;;  %v2137_v43 = vld [vmem:[%s3150_s2 + $0x4] ss:$0 sm:$0xff]  ;;  %v2138_v44 = vld [vmem:[%s3150_s2 + $0x5] ss:$0 sm:$0xff]  ;;  %s2559_s22 = scalar_lea.vmem %s3087_s16, 128  ;;  %p2566_p0 = scmp.lt.s32.totalorder %s3087_s16, %s2564_s21 }
  0x21   : > { %2285 = vmatmul.mubr.msk.bf16.vlgmr.msra.gmra.mrb[0].mxu0 %vm583_vm1, %v2781_v8  ;;  %2293 = vmatmul.mubr.msk.bf16.vlgmr.msra.gmra.mrb[0].mxu1 %vm583_vm1, %v2781_v8  ;;  %v2133_v57 = vld [vmem:[%s3150_s2] ss:$0 sm:$0xff]  ;;  %v2134_v58 = vld [vmem:[%s3150_s2 + $0x1] ss:$0 sm:$0xff]  ;;  %v2139_v61 = vld [vmem:[%s3150_s2 + $0x6] ss:$0 sm:$0xff]  ;;  %p2560_p11 = scmp.ne.s32.totalorder %s3087_s16, %s2559_s22 }
  0x22   : > { %2297 = vmatpush3.bf16.msra.mxu0 %v2513_v5  ;;  %2305 = vmatpush3.bf16.msra.mxu1 %v2514_v6  ;;  %v2140_v62 = vld [vmem:[%s3150_s2 + $0x7] ss:$0 sm:$0xff]  ;;  %s2565_s23 = scalar_lea.vmem %s2564_s21, 256 }
  0x23   : > { %2298 = vmatprep.subr.bf16.mxu0 %v2623_v1  ;;  %2306 = vmatprep.subr.bf16.mxu1 %v2623_v1  ;;  %p2561_p12 = pnand %p2560_p11, %p2734_p5  ;;  %p2567_p1 = scmp.lt.s32.totalorder %s2565_s23, %s2559_s22 }
  0x24   : > { %2300 = vmatprep.mubr.msk.bf16.mxu0 %vm2624_vm0, %v2623_v1  ;;  %2308 = vmatprep.mubr.msk.bf16.mxu1 %vm2624_vm0, %v2623_v1 }
  0x25   : > { %p2562_p13 = pneg %p2561_p12  ;;  %p2568_p2 = por %p2567_p1, %p2566_p0 }
  0x26   : > { %2299 = vmatpush3.bf16.msra.mxu0 %v2515_v9  ;;  %2307 = vmatpush3.bf16.msra.mxu1 %v2516_v10 }
  0x27   : > { %2312 = vmatprep.subr.bf16.mxu0 %v2623_v1  ;;  %2320 = vmatprep.subr.bf16.mxu1 %v2623_v1  ;;  %p2569_p3 = pnand %p2568_p2, %p2562_p13 }
  0x29   : > { %2301 = vmatmul.mubr.msk.bf16.vlgmr.msra.gmra.mrb[4].mxu0 %vm583_vm1, %v2781_v8  ;;  %2309 = vmatmul.mubr.msk.bf16.vlgmr.msra.gmra.mrb[4].mxu1 %vm583_vm1, %v2781_v8 }
  0x2a   : > { %2313 = vmatpush3.bf16.msra.mxu0 %v2517_v11  ;;  %2321 = vmatpush3.bf16.msra.mxu1 %v2518_v12 }
  0x2b   : > { %2314 = vmatprep.subr.bf16.mxu0 %v2623_v1  ;;  %2322 = vmatprep.subr.bf16.mxu1 %v2623_v1 }
  0x2c   : > { %2316 = vmatprep.mubr.msk.bf16.mxu0 %vm2624_vm0, %v2623_v1  ;;  %2324 = vmatprep.mubr.msk.bf16.mxu1 %vm2624_vm0, %v2623_v1 }
  0x2e   : > { %2315 = vmatpush3.bf16.msra.mxu0 %v2519_v13  ;;  %2323 = vmatpush3.bf16.msra.mxu1 %v2520_v14 }
  0x2f   : > { %2328 = vmatprep.subr.bf16.mxu0 %v2623_v1  ;;  %2336 = vmatprep.subr.bf16.mxu1 %v2623_v1 }
  0x31   : > { %2317 = vmatmul.mubr.msk.bf16.vlgmr.msra.gmra.mrb[8].mxu0 %vm583_vm1, %v2781_v8  ;;  %2325 = vmatmul.mubr.msk.bf16.vlgmr.msra.gmra.mrb[8].mxu1 %vm583_vm1, %v2781_v8 }
  0x32   : > { %2329 = vmatpush3.bf16.msra.mxu0 %v2521_v15  ;;  %2337 = vmatpush3.bf16.msra.mxu1 %v2522_v16 }
  0x33   : > { %2330 = vmatprep.subr.bf16.mxu0 %v2623_v1  ;;  %2338 = vmatprep.subr.bf16.mxu1 %v2623_v1 }
  0x34   : > { %2332 = vmatprep.mubr.msk.bf16.mxu0 %vm2624_vm0, %v2623_v1  ;;  %2340 = vmatprep.mubr.msk.bf16.mxu1 %vm2624_vm0, %v2623_v1 }
  0x36   : > { %2331 = vmatpush3.bf16.msra.mxu0 %v2523_v17  ;;  %2339 = vmatpush3.bf16.msra.mxu1 %v2524_v18  ;;  %v2135_v17 = vld [vmem:[%s3150_s2 + $0x2] ss:$0 sm:$0xff]  ;;  %v2136_v18 = vld [vmem:[%s3150_s2 + $0x3] ss:$0 sm:$0xff] }
  0x37   : > { %2344 = vmatprep.subr.bf16.mxu0 %v2623_v1  ;;  %2352 = vmatprep.subr.bf16.mxu1 %v2623_v1 }
  0x39   : > { %2333 = vmatmul.mubr.msk.bf16.vlgmr.msra.gmra.mrb[12].mxu0 %vm583_vm1, %v2781_v8  ;;  %2341 = vmatmul.mubr.msk.bf16.vlgmr.msra.gmra.mrb[12].mxu1 %vm583_vm1, %v2781_v8 }
  0x3a   : > { %2345 = vmatpush3.bf16.msra.mxu0 %v2525_v19  ;;  %2348 = vmatprep.mubr.msk.bf16.mxu0 %vm2624_vm0, %v2623_v1 }
  0x3b   : > { %2346 = vmatprep.subr.bf16.mxu0 %v2623_v1  ;;  %2356 = vmatprep.mubr.msk.bf16.mxu1 %vm2624_vm0, %v2623_v1 }
  0x3c   : > { %2353 = vmatpush3.bf16.msra.mxu1 %v2526_v20 }
  0x3d   : > { %2354 = vmatprep.subr.bf16.mxu1 %v2623_v1 }
  0x3e   : > { %2347 = vmatpush3.bf16.msra.mxu0 %v2527_v21 }
  0x3f   : > { %2360 = vmatprep.subr.bf16.mxu0 %v2623_v1 }
  0x40   : > { %2355 = vmatpush3.bf16.msra.mxu1 %v2528_v22 }
  0x41   : > { %2349 = vmatmul.mubr.msk.bf16.vlgmr.msra.gmra.mrb[16].mxu0 %vm583_vm1, %v2781_v8  ;;  %2368 = vmatprep.subr.bf16.mxu1 %v2623_v1 }
  0x42   : > { %2364 = vmatprep.mubr.msk.bf16.mxu0 %vm2624_vm0, %v2623_v1  ;;  %2361 = vmatpush3.bf16.msra.mxu0 %v2529_v23 }
  0x43   : > { %2357 = vmatmul.mubr.msk.bf16.vlgmr.msra.gmra.mrb[16].mxu1 %vm583_vm1, %v2781_v8  ;;  %2362 = vmatprep.subr.bf16.mxu0 %v2623_v1 }
  0x44   : > { %2369 = vmatpush3.bf16.msra.mxu1 %v2530_v24  ;;  %2372 = vmatprep.mubr.msk.bf16.mxu1 %vm2624_vm0, %v2623_v1 }
  0x45   : > { %2370 = vmatprep.subr.bf16.mxu1 %v2623_v1 }
  0x46   : > { %2363 = vmatpush3.bf16.msra.mxu0 %v2531_v25  ;;  %v2141_v25 = vld [vmem:[%s3150_s2 + $0x8] ss:$0 sm:$0xff] }
  0x47   : > { %2376 = vmatprep.subr.bf16.mxu0 %v2623_v1 }
  0x48   : > { %2371 = vmatpush3.bf16.msra.mxu1 %v2532_v26 }
  0x49   : > { %2382 = vmatprep.subr.bf16.mxu1 %v2623_v1  ;;  %2365 = vmatmul.mubr.msk.bf16.vlgmr.msra.gmra.mrb[20].mxu0 %vm583_vm1, %v2781_v8 }
  0x4a   : > { %2378 = vmatprep.mubr.msk.bf16.mxu0 %vm2624_vm0, %v2623_v1 }
  0x4b   : > { %2373 = vmatmul.mubr.msk.bf16.vlgmr.msra.gmra.mrb[20].mxu1 %vm583_vm1, %v2781_v8 }
  0x4c   : > { %2384 = vmatprep.mubr.msk.bf16.mxu1 %vm2624_vm0, %v2623_v1 }
  0xf4   : > { %v621_v27 = vpop.f32.mrb[0].mxu0  ;;  %v673_v28 = vpop.f32.mrb[0].mxu1 }
  0xf5   : > { %v2286_v29 = vpop.f32.mrb[1].mxu0  ;;  %v2294_v30 = vpop.f32.mrb[1].mxu1  ;;  %v622_v63 = vadd.f32 %v2133_v57, %v621_v27  ;;  %v674_v0 = vadd.f32 %v2134_v58, %v673_v28  ;;  %v2142_v27 = vld [vmem:[%s3150_s2 + $0x9] ss:$0 sm:$0xff] }
  0xf6   : > { %v624_v31 = vpop.f32.mrb[2].mxu0  ;;  %v676_v32 = vpop.f32.mrb[2].mxu1 }
  0xf7   : > { %v2287_v33 = vpop.f32.mrb[3].mxu0  ;;  %v2295_v34 = vpop.f32.mrb[3].mxu1  ;;  %v1199_v11 = vpack.c.bf16 %v622_v63, %v622_v63  ;;  %v1200_v12 = vpack.c.bf16 %v674_v0, %v674_v0 }
  0xfc   : > { %v725_v35 = vpop.f32.mrb[4].mxu0  ;;  %v777_v36 = vpop.f32.mrb[4].mxu1 }
  0xfd   : > { %v2302_v37 = vpop.f32.mrb[5].mxu0  ;;  %v2310_v38 = vpop.f32.mrb[5].mxu1  ;;  %v726_v21 = vadd.f32 %v2135_v17, %v725_v35  ;;  %v778_v22 = vadd.f32 %v2136_v18, %v777_v36 }
  0xfe   : > { %v728_v39 = vpop.f32.mrb[6].mxu0  ;;  %v780_v40 = vpop.f32.mrb[6].mxu1 }
  0xff   : > { %v2303_v41 = vpop.f32.mrb[7].mxu0  ;;  %v2311_v42 = vpop.f32.mrb[7].mxu1  ;;  %v1201_v23 = vpack.c.bf16 %v726_v21, %v726_v21  ;;  %v1202_v24 = vpack.c.bf16 %v778_v22, %v778_v22 }
 0x104   : > { %v829_v45 = vpop.f32.mrb[8].mxu0  ;;  %v881_v46 = vpop.f32.mrb[8].mxu1 }
 0x105   : > { %v830_v47 = vadd.f32 %v2137_v43, %v829_v45  ;;  %v882_v48 = vadd.f32 %v2138_v44, %v881_v46  ;;  %v2318_v49 = vpop.f32.mrb[9].mxu0  ;;  %v2326_v50 = vpop.f32.mrb[9].mxu1 }
 0x106   : > { %v832_v51 = vpop.f32.mrb[10].mxu0  ;;  %v884_v52 = vpop.f32.mrb[10].mxu1 }
 0x107   : > { %v1203_v53 = vpack.c.bf16 %v830_v47, %v830_v47  ;;  %v1204_v54 = vpack.c.bf16 %v882_v48, %v882_v48  ;;  %v2319_v55 = vpop.f32.mrb[11].mxu0  ;;  %v2327_v56 = vpop.f32.mrb[11].mxu1 }
 0x109   : > { %v1216_v59 = vsel %vm1211_vm2, %v1203_v53, 0  ;;  %v1262_v60 = vsel %vm1211_vm2, %v1204_v54, 0 }
 0x10a   : > { %2377 = vmatpush3.bf16.xpose.msra.mxu0 %v1216_v59  ;;  %2383 = vmatpush3.bf16.xpose.msra.mxu1 %v1262_v60 }
 0x10b   : > { %2388 = vmatprep.subr.bf16.mxu0 %v2623_v1  ;;  %2394 = vmatprep.subr.bf16.mxu1 %v2623_v1 }
 0x10c   : > { %v933_v2 = vpop.f32.mrb[12].mxu0  ;;  %v985_v3 = vpop.f32.mrb[12].mxu1 }
 0x10d   : > { %v934_v4 = vadd.f32 %v2139_v61, %v933_v2  ;;  %v986_v5 = vadd.f32 %v2140_v62, %v985_v3  ;;  %v2334_v6 = vpop.f32.mrb[13].mxu0  ;;  %v2342_v8 = vpop.f32.mrb[13].mxu1 }
 0x10e   : > { %v936_v9 = vpop.f32.mrb[14].mxu0  ;;  %v988_v10 = vpop.f32.mrb[14].mxu1 }
 0x10f   : > { %v1205_v13 = vpack.c.bf16 %v934_v4, %v934_v4  ;;  %v1206_v14 = vpack.c.bf16 %v986_v5, %v986_v5  ;;  %v2335_v15 = vpop.f32.mrb[15].mxu0  ;;  %v2343_v16 = vpop.f32.mrb[15].mxu1 }
 0x111   : > { %v1308_v19 = vsel %vm1211_vm2, %v1205_v13, 0  ;;  %v1354_v20 = vsel %vm1211_vm2, %v1206_v14, 0  ;;  %2379 = vmatmul.mubr.msk.bf16.vlgmr.msra.gmra.mrb[24].mxu0 %vm1211_vm2, %v1199_v11  ;;  %2385 = vmatmul.mubr.msk.bf16.vlgmr.msra.gmra.mrb[24].mxu1 %vm1211_vm2, %v1200_v12 }
 0x112   : > { %2389 = vmatpush3.bf16.xpose.msra.mxu0 %v1308_v19  ;;  %2395 = vmatpush3.bf16.xpose.msra.mxu1 %v1354_v20 }
 0x113   : > { %2390 = vmatprep.mubr.msk.bf16.mxu0 %vm2624_vm0, %v2623_v1  ;;  %2396 = vmatprep.mubr.msk.bf16.mxu1 %vm2624_vm0, %v2623_v1 }
 0x114   : > { %2400 = vmatprep.subr.bf16.mxu0 %v2623_v1  ;;  %2406 = vmatprep.subr.bf16.mxu1 %v2623_v1  ;;  %v1037_v26 = vpop.f32.mrb[16].mxu0 }
 0x115   : > { %v1038_v28 = vadd.f32 %v2141_v25, %v1037_v26  ;;  %v2350_v29 = vpop.f32.mrb[17].mxu0 }
 0x116   : > { %v1040_v30 = vpop.f32.mrb[18].mxu0  ;;  %v1089_v31 = vpop.f32.mrb[16].mxu1 }
 0x117   : > { %v1207_v32 = vpack.c.bf16 %v1038_v28, %v1038_v28  ;;  %v2351_v33 = vpop.f32.mrb[19].mxu0  ;;  %v1090_v34 = vadd.f32 %v2142_v27, %v1089_v31  ;;  %v2358_v35 = vpop.f32.mrb[17].mxu1 }
 0x118   : > { %v1092_v36 = vpop.f32.mrb[18].mxu1  ;;  %v2143_v33 = vld [vmem:[%s3150_s2 + $0xa] ss:$0 sm:$0xff] }
 0x119   : > { %2391 = vmatmul.mubr.msk.bf16.vlgmr.msra.gmra.mrb[28].mxu0 %vm1211_vm2, %v1201_v23  ;;  %2397 = vmatmul.mubr.msk.bf16.vlgmr.msra.gmra.mrb[28].mxu1 %vm1211_vm2, %v1202_v24  ;;  %v1453_v37 = vsel %vm1451_vm3, %v1207_v32, 0  ;;  %v1208_v38 = vpack.c.bf16 %v1090_v34, %v1090_v34  ;;  %v2359_v39 = vpop.f32.mrb[19].mxu1  ;;  %v2144_v36 = vld [vmem:[%s3150_s2 + $0xb] ss:$0 sm:$0xff]  ;;  %s3085_s2 = scalar_lea.hbm %s3141_s13, %s2209_s30 }
 0x11a   : > { %2402 = vmatprep.mubr.msk.bf16.mxu0 %vm2624_vm0, %v2623_v1  ;;  %2408 = vmatprep.mubr.msk.bf16.mxu1 %vm2624_vm0, %v2623_v1 }
 0x11b   : > { %2401 = vmatpush3.bf16.msra.mxu0 %v1453_v37  ;;  %v1499_v40 = vsel %vm1451_vm3, %v1208_v38, 0 }
 0x11c   : > { %2412 = vmatprep.subr.bf16.mxu0 %v2623_v1  ;;  %2407 = vmatpush3.bf16.msra.mxu1 %v1499_v40  ;;  %v2959_v41 = vpop.f32.mrb[20].mxu0 }
 0x11d   : > { %2418 = vmatprep.subr.bf16.mxu1 %v2623_v1  ;;  %v2366_v43 = vpop.f32.mrb[21].mxu0  ;;  %v1142_v34 = vadd.f32 %v2143_v33, %v2959_v41 }
 0x11e   : > { %v2961_v42 = vpop.f32.mrb[20].mxu1  ;;  %v1144_v45 = vpop.f32.mrb[22].mxu0 }
 0x11f   : > { %v2374_v44 = vpop.f32.mrb[21].mxu1  ;;  %v2367_v47 = vpop.f32.mrb[23].mxu0  ;;  %v1209_v38 = vpack.c.bf16 %v1142_v34, %v1142_v34  ;;  %v1194_v39 = vadd.f32 %v2144_v36, %v2961_v42  ;;  %v1637_v42 = vld [vmem:[%s3131_s3] sm:$0xf] }
 0x120   : > { %v1196_v46 = vpop.f32.mrb[22].mxu1 }
 0x121   : > { %v2375_v48 = vpop.f32.mrb[23].mxu1  ;;  %v1545_v46 = vsel %vm1451_vm3, %v1209_v38, 0  ;;  %v1210_v47 = vpack.c.bf16 %v1194_v39, %v1194_v39 }
 0x1e4   : > { %v1252_v49 = vpop.f32.mrb[24].mxu0  ;;  %v1298_v50 = vpop.f32.mrb[24].mxu1 }
 0x1e5   : > { %v1396_v51 = vmul.f32 0.35355338, %v1252_v49  ;;  %v2380_v52 = vpop.f32.mrb[25].mxu0  ;;  %v2386_v53 = vpop.f32.mrb[25].mxu1  ;;  %v1397_v56 = vmul.f32 0.35355338, %v1298_v50 }
 0x1e6   : > { %v1255_v54 = vpop.f32.mrb[26].mxu0  ;;  %v1301_v55 = vpop.f32.mrb[26].mxu1  ;;  %v1591_v50 = vsel %vm1451_vm3, %v1210_v47, 0  ;;  %v1645_v53 = vsel %vm1451_vm3, %v1637_v42, 0 }
 0x1e7   : > { %v2381_v57 = vpop.f32.mrb[27].mxu0  ;;  %v2387_v58 = vpop.f32.mrb[27].mxu1  ;;  %v1400_v59 = vsel %vm1211_vm2, %v1396_v51, -inf  ;;  %v1403_v60 = vsel %vm1211_vm2, %v1397_v56, -inf }
 0x1e8   : > { %1401 = vmax.xlane.f32.xlu0 %v1400_v59  ;;  %v1638_v57 = vld [vmem:[%s3131_s3 + $0x4] sm:$0xf]  ;;  %v1639_v59 = vld [vmem:[%s3131_s3 + $0x8] sm:$0xf] }
 0x1e9   : > { %v1691_v58 = vsel %vm1451_vm3, %v1638_v57, 0 }
 0x1ec   : > { %v1390_v61 = vpop.f32.mrb[28].mxu1  ;;  %1404 = vmax.xlane.f32.xlu0 %v1403_v60  ;;  %v1344_v62 = vpop.f32.mrb[28].mxu0 }
 0x1ed   : > { %v1398_v63 = vmul.f32 0.35355338, %v1344_v62  ;;  %v2392_v0 = vpop.f32.mrb[29].mxu0  ;;  %v2398_v2 = vpop.f32.mrb[29].mxu1  ;;  %v1399_v5 = vmul.f32 0.35355338, %v1390_v61 }
 0x1ee   : > { %v1347_v3 = vpop.f32.mrb[30].mxu0  ;;  %v1393_v4 = vpop.f32.mrb[30].mxu1  ;;  %v1640_v2 = vld [vmem:[%s3131_s3 + $0xc] sm:$0xf] }
 0x1ef   : > { %v2393_v6 = vpop.f32.mrb[31].mxu0  ;;  %v2399_v8 = vpop.f32.mrb[31].mxu1  ;;  %v1406_v9 = vsel %vm1211_vm2, %v1398_v63, -inf  ;;  %v1409_v10 = vsel %vm1211_vm2, %v1399_v5, -inf }
 0x1f0   : > { %1407 = vmax.xlane.f32.xlu1 %v1406_v9  ;;  %v1783_v8 = vsel %vm1451_vm3, %v1640_v2, 0 }
 0x1f4   : > { %1410 = vmax.xlane.f32.xlu1 %v1409_v10 }
 0x275   : > { %v1402_v11 = vpop.xlane.xlu0 %1401 }
 0x276   : > { %v1412_v12 = vsub.f32 %v1396_v51, %v1402_v11 }
 0x278   : > { %v1416_v13 = vmul.f32 1.442695, %v1412_v12 }
 0x279   : > { %v1405_v14 = vpop.xlane.xlu0 %1404 }
 0x27a   : > { %2539 = vpow2.f32 %v1416_v13  ;;  %v1413_v15 = vsub.f32 %v1397_v56, %v1405_v14 }
 0x27c   : > { %v1418_v16 = vmul.f32 1.442695, %v1413_v15 }
 0x27d   : > { %v1408_v17 = vpop.xlane.xlu1 %1407 }
 0x27e   : > { %2541 = vpow2.f32 %v1418_v16  ;;  %v1414_v18 = vsub.f32 %v1398_v63, %v1408_v17  ;;  %v1737_v63 = vsel %vm1451_vm3, %v1639_v59, 0 }
 0x280   : > { %v1420_v19 = vmul.f32 1.442695, %v1414_v18 }
 0x281   : > { %v1411_v20 = vpop.xlane.xlu1 %1410 }
 0x282   : > { %2543 = vpow2.f32 %v1420_v19  ;;  %v1415_v21 = vsub.f32 %v1399_v5, %v1411_v20 }
 0x284   : > { %v2540_v22 = vpop.eup %2539  ;;  %v1422_v23 = vmul.f32 1.442695, %v1415_v21 }
 0x285   : > { %v1424_v24 = vsel %vm1211_vm2, %v2540_v22, 0.0 }
 0x286   : > { %2545 = vpow2.f32 %v1422_v23  ;;  %1425 = vadd.xlane.f32.xlu0 %v1424_v24 }
 0x288   : > { %v2542_v25 = vpop.eup %2541 }
 0x289   : > { %v1427_v26 = vsel %vm1211_vm2, %v2542_v25, 0.0 }
 0x28a   : > { %1428 = vadd.xlane.f32.xlu1 %v1427_v26 }
 0x28c   : > { %v2544_v27 = vpop.eup %2543 }
 0x28d   : > { %v1430_v28 = vsel %vm1211_vm2, %v2544_v27, 0.0 }
 0x28e   : > { %1431 = vadd.xlane.f32.xlu0 %v1430_v28 }
 0x290   : > { %v2546_v29 = vpop.eup %2545 }
 0x291   : > { %v1433_v30 = vsel %vm1211_vm2, %v2546_v29, 0.0 }
 0x292   : > { %1434 = vadd.xlane.f32.xlu1 %v1433_v30 }
 0x313   : > { %v1426_v31 = vpop.xlane.xlu0 %1425 }
 0x314   : > { %2547 = vrcp.f32 %v1426_v31 }
 0x317   : > { %v1429_v32 = vpop.xlane.xlu1 %1428 }
 0x318   : > { %2549 = vrcp.f32 %v1429_v32 }
 0x31b   : > { %v1432_v35 = vpop.xlane.xlu0 %1431 }
 0x31c   : > { %2551 = vrcp.f32 %v1432_v35 }
 0x31e   : > { %v2548_v37 = vpop.eup %2547 }
 0x31f   : > { %v1440_v40 = vmul.f32 %v2548_v37, %v2540_v22  ;;  %v1435_v43 = vpop.xlane.xlu1 %1434 }
 0x320   : > { %2553 = vrcp.f32 %v1435_v43 }
 0x321   : > { %v1444_v44 = vpack.c.bf16 %v1440_v40, %v1440_v40  ;;  %v2193_v40 = vld [vmem:[%s3132_s4] ss:$0 sm:$0xff] }
 0x322   : > { %v2550_v45 = vpop.eup %2549 }
 0x323   : > { %v1441_v48 = vmul.f32 %v2550_v45, %v2542_v25  ;;  %2403 = vmatmul.mubr.msk.bf16.vlgmr.msra.gmra.mrb[32].mxu0 %vm1211_vm2, %v1444_v44 }
 0x324   : > { %2413 = vmatpush3.bf16.msra.mxu0 %v1545_v46  ;;  %2414 = vmatprep.mubr.msk.bf16.mxu0 %vm2624_vm0, %v2623_v1 }
 0x325   : > { %v1445_v41 = vpack.c.bf16 %v1441_v48, %v1441_v48  ;;  %2424 = vmatprep.subr.bf16.mxu0 %v2623_v1 }
 0x326   : > { %v2552_v49 = vpop.eup %2551 }
 0x327   : > { %v1442_v51 = vmul.f32 %v2552_v49, %v2544_v27  ;;  %2409 = vmatmul.mubr.msk.bf16.vlgmr.msra.gmra.mrb[32].mxu1 %vm1211_vm2, %v1445_v41 }
 0x328   : > { %2419 = vmatpush3.bf16.msra.mxu1 %v1591_v50  ;;  %2420 = vmatprep.mubr.msk.bf16.mxu1 %vm2624_vm0, %v2623_v1 }
 0x329   : > { %v1446_v52 = vpack.c.bf16 %v1442_v51, %v1442_v51  ;;  %2430 = vmatprep.subr.bf16.mxu1 %v2623_v1 }
 0x32a   : > { %v2554_v54 = vpop.eup %2553 }
 0x32b   : > { %v1443_v55 = vmul.f32 %v2554_v54, %v2546_v29  ;;  %2415 = vmatmul.mubr.msk.bf16.vlgmr.msra.gmra.mrb[36].mxu0 %vm1211_vm2, %v1446_v52  ;;  %v2534_v54 = vld [vmem:[%s3135_s7 + $0x8] sm:$0xff]  }
 0x32c   : > { %2425 = vmatpush3.bf16.msra.mxu0 %v1645_v53  ;;  %2426 = vmatprep.mubr.msk.bf16.mxu0 %vm2624_vm0, %v2623_v1  ;;  %v2533_v53 = vld [vmem:[%s3135_s7] sm:$0xff]  }
 0x32d   : > { %v1447_v56 = vpack.c.bf16 %v1443_v55, %v1443_v55  ;;  %2436 = vmatprep.subr.bf16.mxu0 %v2623_v1  ;;  %v2536_v55 = vld [vmem:[%s3137_s9 + $0x8] sm:$0xff]  }
 0x32f   : > { %2421 = vmatmul.mubr.msk.bf16.vlgmr.msra.gmra.mrb[36].mxu1 %vm1211_vm2, %v1447_v56 }
 0x330   : > { %2432 = vmatprep.mubr.msk.bf16.mxu1 %vm2624_vm0, %v2623_v1  ;;  %2431 = vmatpush3.bf16.msra.mxu1 %v1691_v58 }
 0x331   : > { %2442 = vmatprep.subr.bf16.mxu1 %v2623_v1 }
 0x3f6   : > { %v1489_v60 = vpop.f32.mrb[32].mxu0 }
 0x3f7   : > { %v1633_v61 = vpack.c.bf16 %v1489_v60, %v1489_v60  ;;  %v2404_v62 = vpop.f32.mrb[33].mxu0  ;;  %v2194_v60 = vld [vmem:[%s3133_s5] ss:$0 sm:$0xff] }
 0x3f8   : > { %v1492_v0 = vpop.f32.mrb[34].mxu0  ;;  %v2195_v62 = vld [vmem:[%s3134_s6] ss:$0 sm:$0xff] }
 0x3f9   : > { %v2405_v3 = vpop.f32.mrb[35].mxu0  ;;  %2427 = vmatmul.mubr.msk.bf16.vlgmr.msra.gmra.mrb[40].mxu0 %vm1211_vm2, %v1633_v61 }
 0x3fa   : > { %v1535_v4 = vpop.f32.mrb[32].mxu1  ;;  %2437 = vmatpush3.bf16.msra.mxu0 %v1737_v63  ;;  %2438 = vmatprep.mubr.msk.bf16.mxu0 %vm2624_vm0, %v2623_v1  ;;  %v2537_v3 = vld [vmem:[%s3137_s9 + $0x10] sm:$0xff]  }
 0x3fb   : > { %v1634_v5 = vpack.c.bf16 %v1535_v4, %v1535_v4  ;;  %v2410_v6 = vpop.f32.mrb[33].mxu1  ;;  %2448 = vmatprep.subr.bf16.mxu0 %v2623_v1  ;;  %v2538_v4 = vld [vmem:[%s3137_s9 + $0x18] sm:$0xff]  }
 0x3fc   : > { %v1538_v9 = vpop.f32.mrb[34].mxu1 }
 0x3fd   : > { %v2411_v10 = vpop.f32.mrb[35].mxu1  ;;  %2433 = vmatmul.mubr.msk.bf16.vlgmr.msra.gmra.mrb[40].mxu1 %vm1211_vm2, %v1634_v5  ;;  %v2196_v5 = vld [vmem:[%s3136_s8] ss:$0 sm:$0xff] }
 0x3fe   : > { %v1581_v11 = vpop.f32.mrb[36].mxu0  ;;  %2443 = vmatpush3.bf16.msra.mxu1 %v1783_v8  ;;  %2444 = vmatprep.mubr.msk.bf16.mxu1 %vm2624_vm0, %v2623_v1 }
 0x3ff   : > { %v1635_v12 = vpack.c.bf16 %v1581_v11, %v1581_v11  ;;  %v2416_v13 = vpop.f32.mrb[37].mxu0  ;;  %2456 = vmatprep.subr.bf16.mxu1 %v2623_v1 }
 0x400   : > { %v1584_v14 = vpop.f32.mrb[38].mxu0 }
 0x401   : > { %v2417_v15 = vpop.f32.mrb[39].mxu0  ;;  %2439 = vmatmul.mubr.msk.bf16.vlgmr.msra.gmra.mrb[44].mxu0 %vm1211_vm2, %v1635_v12 }
 0x402   : > { %v1627_v16 = vpop.f32.mrb[36].mxu1  ;;  %2452 = vmatprep.mubr.msk.bf16.mxu0 %vm2624_vm0, %v2623_v1  ;;  %2449 = vmatpush3.bf16.msra.mxu0 %v2533_v53 }
 0x403   : > { %v1636_v17 = vpack.c.bf16 %v1627_v16, %v1627_v16  ;;  %v2422_v18 = vpop.f32.mrb[37].mxu1  ;;  %2450 = vmatprep.subr.bf16.mxu0 %v2623_v1 }
 0x404   : > { %v1630_v19 = vpop.f32.mrb[38].mxu1 }
 0x405   : > { %v2423_v20 = vpop.f32.mrb[39].mxu1  ;;  %2445 = vmatmul.mubr.msk.bf16.vlgmr.msra.gmra.mrb[44].mxu1 %vm1211_vm2, %v1636_v17 }
 0x406   : > { %2464 = vmatprep.mubr.msk.bf16.mxu1 %vm2624_vm0, %v2623_v1  ;;  %2451 = vmatpush3.bf16.msra.mxu0 %v2534_v54 }
 0x4cc   : > { %v1681_v21 = vpop.f32.mrb[40].mxu0 }
 0x4cd   : > { %v2428_v22 = vpop.f32.mrb[41].mxu0  ;;  %v1825_v26 = vsel %vm583_vm1, %v1681_v21, 0.0 }
 0x4ce   : > { %v1684_v23 = vpop.f32.mrb[42].mxu0 }
 0x4cf   : > { %v2429_v24 = vpop.f32.mrb[43].mxu0 }
 0x4d0   : > { %v1727_v25 = vpop.f32.mrb[40].mxu1 }
 0x4d1   : > { %v1826_v27 = vsel %vm583_vm1, %v1727_v25, 0.0  ;;  %v2434_v28 = vpop.f32.mrb[41].mxu1 }
 0x4d2   : > { %v1827_v29 = vadd.f32 %v1826_v27, %v1825_v26  ;;  %v1730_v30 = vpop.f32.mrb[42].mxu1 }
 0x4d3   : > { %v2435_v31 = vpop.f32.mrb[43].mxu1  ;;  %v2206_v30 = vld [vmem:[%s3139_s11] ss:$0 sm:$0xff] }
 0x4d4   : > { %v1773_v32 = vpop.f32.mrb[44].mxu0 }
 0x4d5   : > { %v1828_v33 = vsel %vm583_vm1, %v1773_v32, 0.0  ;;  %v2440_v34 = vpop.f32.mrb[45].mxu0  ;;  %v2207_v32 = vld [vmem:[%s3140_s12] ss:$0 sm:$0xff] }
 0x4d6   : > { %v1829_v35 = vadd.f32 %v1828_v33, %v1827_v29  ;;  %v1776_v36 = vpop.f32.mrb[46].mxu0 }
 0x4d7   : > { %v2441_v37 = vpop.f32.mrb[47].mxu0 }
 0x4d8   : > { %v1819_v38 = vpop.f32.mrb[44].mxu1 }
 0x4d9   : > { %v1830_v39 = vsel %vm583_vm1, %v1819_v38, 0.0  ;;  %v2446_v43 = vpop.f32.mrb[45].mxu1 }
 0x4da   : > { %v1831_v44 = vadd.f32 %v1830_v39, %v1829_v35  ;;  %v1822_v45 = vpop.f32.mrb[46].mxu1 }
 0x4db   : > { %v2447_v46 = vpop.f32.mrb[47].mxu1 }
 0x4dc   : > { %v1839_v47 = vadd.f32 %v2193_v40, %v1831_v44 }
 0x4de   : > { %v1840_v48 = vadd.f32 %v1839_v47, %v2776_v7  ;;  %v2535_v7 = vld [vmem:[%s3137_s9] sm:$0xff]  }
 0x4df   : > { %2457 = vmatpush3.bf16.msra.mxu1 %v2535_v7 }
 0x4e0   : > { %v1843_v41 = vsel %vm583_vm1, %v1840_v48, 0.0  ;;  %2458 = vmatprep.subr.bf16.mxu1 %v2623_v1 }
 0x4e1   : > { %1844 = vadd.xlane.f32.xlu0 %v1843_v41 }
 0x4e3   : > { %2459 = vmatpush3.bf16.msra.mxu1 %v2536_v55 }
 0x4e4   : > { %2460 = vmatprep.subr.bf16.mxu1 %v2623_v1 }
 0x4e7   : > { %2461 = vmatpush3.bf16.msra.mxu1 %v2537_v3 }
 0x4e8   : > { %2462 = vmatprep.subr.bf16.mxu1 %v2623_v1  ;;  %v2200_v1 = vld [vmem:[%s3138_s10] ss:$0 sm:$0xff] }
 0x4eb   : > { %2463 = vmatpush3.bf16.msra.mxu1 %v2538_v4 }
 0x56e   : > { %v1845_v49 = vpop.xlane.xlu0 %1844 }
 0x56f   : > { %v1847_v42 = vmul.f32 0.03125, %v1845_v49 }
 0x571   : > { %v1848_v50 = vsub.f32 %v1840_v48, %v1847_v42 }
 0x573   : > { %v1849_v51 = vmul.f32 %v1848_v50, %v1848_v50 }
 0x575   : > { %v1850_v52 = vsel %vm583_vm1, %v1849_v51, 0.0 }
 0x576   : > { %1851 = vadd.xlane.f32.xlu1 %v1850_v52 }
 0x603   : > { %v1852_v56 = vpop.xlane.xlu1 %1851 }
 0x604   : > { %v1853_v57 = vmul.f32 0.03125, %v1852_v56 }
 0x606   : > { %v1854_v58 = vadd.f32 1e-05, %v1853_v57 }
 0x608   : > { %2555 = vrsqrt.f32 %v1854_v58 }
 0x612   : > { %v2556_v59 = vpop.eup %2555 }
 0x613   : > { %v1856_v61 = vmul.f32 %v2556_v59, %v1848_v50 }
 0x615   : > { %v1863_v63 = vmul.f32 %v2194_v60, %v1856_v61 }
 0x617   : > { %v1870_v0 = vadd.f32 %v2195_v62, %v1863_v63 }
 0x619   : > { %v1871_v2 = vpack.c.bf16 %v1870_v0, %v1870_v0 }
 0x61b   : > { %2453 = vmatmul.mubr.msk.bf16.vlgmr.msra.gmra.mrb[48].mxu0 %vm583_vm1, %v1871_v2 }
 0x6ee   : > { %v1932_v6 = vpop.f32.mrb[48].mxu0 }
 0x6ef   : > { %v1933_v8 = vadd.f32 %v2196_v5, %v1932_v6  ;;  %v2454_v9 = vpop.f32.mrb[49].mxu0 }
 0x6f0   : > { %v1935_v10 = vpop.f32.mrb[50].mxu0 }
 0x6f1   : > { %v1938_v11 = vmax.f32 %v1933_v8, 0.0  ;;  %v2455_v12 = vpop.f32.mrb[51].mxu0 }
 0x6f3   : > { %v1939_v13 = vpack.c.bf16 %v1938_v11, %v1938_v11 }
 0x6f5   : > { %2465 = vmatmul.mubr.msk.bf16.vlgmr.msra.gmra.mrb[48].mxu1 %vm1979_vm4, %v1939_v13 }
 0x7c8   : > { %v2017_v14 = vpop.f32.mrb[48].mxu1 }
 0x7c9   : > { %v2018_v15 = vadd.f32 %v2200_v1, %v2017_v14  ;;  %v2466_v16 = vpop.f32.mrb[49].mxu1 }
 0x7ca   : > { %v2020_v17 = vpop.f32.mrb[50].mxu1 }
 0x7cb   : > { %v2467_v18 = vpop.f32.mrb[51].mxu1  ;;  %v2023_v19 = vadd.f32 %v2018_v15, %v1870_v0 }
 0x7cd   : > { %v2026_v20 = vsel %vm583_vm1, %v2023_v19, 0.0 }
 0x7ce   : > { %2027 = vadd.xlane.f32.xlu0 %v2026_v20 }
 0x85b   : > { %v2028_v21 = vpop.xlane.xlu0 %2027 }
 0x85c   : > { %v2029_v22 = vmul.f32 0.03125, %v2028_v21 }
 0x85e   : > { %v2030_v23 = vsub.f32 %v2023_v19, %v2029_v22 }
 0x860   : > { %v2031_v24 = vmul.f32 %v2030_v23, %v2030_v23 }
 0x862   : > { %v2032_v25 = vsel %vm583_vm1, %v2031_v24, 0.0 }
 0x863   : > { %2033 = vadd.xlane.f32.xlu1 %v2032_v25 }
 0x8f0   : > { %v2034_v26 = vpop.xlane.xlu1 %2033 }
 0x8f1   : > { %v2035_v27 = vmul.f32 0.03125, %v2034_v26 }
 0x8f3   : > { %v2036_v28 = vadd.f32 1e-05, %v2035_v27 }
 0x8f5   : > { %2557 = vrsqrt.f32 %v2036_v28 }
 0x8ff   : > { %v2558_v29 = vpop.eup %2557 }
 0x900   : > { %v2038_v31 = vmul.f32 %v2558_v29, %v2030_v23 }
 0x902   : > { %v2045_v33 = vmul.f32 %v2206_v30, %v2038_v31 }
 0x904   : > { %v2052_v34 = vadd.f32 %v2207_v32, %v2045_v33 }
 0x906   : > { %2053 = vst.msk [vmem:[%s431_s15] sm:$0xff] %vm583_vm1, %v2052_v34 }
 0x907   : > { %2572 = shalt.err (!%p2569_p3)
}
 0x908   : > { %s2573_s0 = scalar_lea.hbm %s3085_s2, 128  ;;  %s2577_s24 = scalar_lea.hbm %s3141_s13, 256 }
 0x909   : > { %p2574_p4 = scmp.ne.s32.totalorder %s3085_s2, %s2573_s0  ;;  %p2578_p9 = scmp.lt.u32.totalorder %s3085_s2, %s3141_s13 }
 0x90a   : > { %p2579_p10 = scmp.lt.u32.totalorder %s2577_s24, %s2573_s0  ;;  %p2581_p12 = scmp.lt.u32.totalorder %s2573_s0, %s3085_s2 }
 0x90b   : > { %p2575_p7 = pnand %p2574_p4, %p2734_p5 }
 0x90c   : > { %p2580_p11 = por %p2579_p10, %p2578_p9 }
 0x90d   : > { %p2576_p8 = pneg %p2575_p7 }
 0x90e   : > { %p2582_p13 = por %p2581_p12, %p2580_p11 }
 0x910   : > { %p2583_p0 = pnand %p2582_p13, %p2576_p8 }
 0x912   : > { %2586 = shalt.err (!%p2583_p0)
}
 0x913   : > { %2468 = dma.vmem_to_hbm [thread:$0]  (%p2734_p5), %s3087_s16, 128, %s3085_s2, %s2055_s17  }
 0x914 PF: > { %p2474_p1 = scmp.ge.s32.totalorder %s2621_s28, 2  ;;  %s2080_s22 = sand.u32 1, %s2609_s25  }
 0x915   : > { %s2081_s29 = scalar_lea.sflag [#allocation3], %s2080_s22 }
 0x916   : > { %p2471_p2 = pnand %p2474_p1, %p2738_p6 }
 0x918   : > { %2604 = dma.done.wait (!%p2471_p2), %s2081_s29, 128  }
 0x919   : > { %2606 = vsyncadd (!%p2471_p2), %s2081_s29, 4294967168  ;;  %s3151_s21 = sld [smem:[#allocation5_spill]]  ;;  %p23_p3 = scmp.ge.s32.totalorder %s2721_s14, 4  }
 0x91a   : > { %s3152_s25 = smov %s2613_s26  ;;  %s3153_s26 = smov %s2617_s27 }
 0x91b   : > { %s3155_s28 = smov %s2721_s14  ;;  %25 = sbr.rel (!%p23_p3) target bundleno = 7 (0x7), region = 107 }
 0x91f   : > { %s3154_s27 = smov %s3151_s21 }
 0x922   :  { %2086 = vsyncpa [#allocation3], 1 }
 0x923   :  { %2088 = vsyncpa [#allocation3 + $0x1], 1 }

</bundles_post_ra>
